<compile_context>
chip_gen: v7x
topology: tpu7x:2x2x1
jax: 0.10.0
libtpu: 0.0.40
codegen_flags: <defaults>
</compile_context>

<pallas_src>
import functools

import jax
import jax.numpy as jnp
from jax.experimental import pallas as pl
from jax.experimental.pallas import tpu as pltpu


def _round_up(x, m):
    return ((x + m - 1) // m) * m


def _make_contrastive_loss_kernel(margin, eps, n_valid, tb):
    # Plain Python scalars only: jnp.float32(...) constants would be captured
    # jax arrays and rejected by pallas_call.
    margin = float(margin)
    eps = float(eps)
    n_valid = int(n_valid)
    tb = int(tb)

    def kernel(x1_ref, x2_ref, label_ref, o_ref):
        i = pl.program_id(0)

        # Inputs stay in caller dtype in HBM; upcast here (VPU, hides under DMA).
        x1 = x1_ref[...].astype(jnp.float32)
        x2 = x2_ref[...].astype(jnp.float32)
        label = label_ref[...].astype(jnp.float32)            # (tb, 1)

        diff = x1 - x2 + eps                                   # pairwise_distance eps
        sq = jnp.sum(diff * diff, axis=-1, keepdims=True)      # (tb, 1) == d^2
        d = jnp.sqrt(sq)
        hinge = jnp.maximum(margin - d, 0.0)
        per_row = (1.0 - label) * sq + label * (hinge * hinge)

        # Mask rows past B: the ragged last tile is delivered without padding in
        # HBM, so out-of-range rows may hold garbage (even NaN); jnp.where is a
        # select, so those values never reach the sum.
        row = i * tb + jax.lax.broadcasted_iota(jnp.int32, (tb, 1), 0)
        per_row = jnp.where(row < n_valid, per_row, 0.0)

        # Per-tile partial sum broadcast into a lane-dense block -> each grid
        # step owns its output block, so the axis is fully parallel (v7x 2 TCs).
        psum = jnp.sum(per_row)
        o_ref[...] = jnp.full((1, 8, 128), psum, dtype=jnp.float32)

    return kernel


def _choose_block_rows(B, D, x_itemsize, max_block_rows=None):
    # Double-buffered VMEM footprint per row:
    #   2 bufs * (2 inputs * D * itemsize + 128*4 lane-padded label row)
    # Target ~24 MiB total: >=2 MiB per input block at large D (HBM roofline),
    # and comfortably inside v7x's 64 MiB physical VMEM.
    budget = 24 * 1024 * 1024
    per_row = 2 * (2 * D * x_itemsize + 128 * 4)
    tb = max(8, (budget // per_row) // 8 * 8)
    tb = min(tb, _round_up(B, 8))
    if max_block_rows is not None:
        tb = min(tb, max(8, _round_up(int(max_block_rows), 8)))
    return int(tb)


@functools.partial(jax.jit, static_argnames=("margin", "max_block_rows"))
def contrastive_loss(output1, output2, label, *, margin=2.0, max_block_rows=None):
    """output1/output2: (B, D) float (f32 or bf16), label: (B,) or (B, 1) in {0,1}.

    Returns the scalar contrastive loss (f32).
    """
    output1 = jnp.asarray(output1)
    output2 = jnp.asarray(output2)
    B, D = output1.shape
    label = jnp.asarray(label).reshape(B, 1)
    if not jnp.issubdtype(label.dtype, jnp.floating):
        label = label.astype(jnp.float32)        # tiny array; keeps kernel simple

    x1_isz = jnp.dtype(output1.dtype).itemsize
    x2_isz = jnp.dtype(output2.dtype).itemsize
    tb = _choose_block_rows(B, D, max(x1_isz, x2_isz), max_block_rows)
    n_tiles = pl.cdiv(B, tb)

    # Actual double-buffered footprint (+4 MiB headroom), capped for v7x.
    x_block = tb * D * max(x1_isz, x2_isz)
    label_block = tb * 128 * 4                    # lane-padded (conservative f32)
    footprint = 2 * (2 * x_block + label_block) + n_tiles * 8 * 128 * 4
    vmem_limit = int(min(footprint + (4 << 20), 48 << 20))

    kernel = _make_contrastive_loss_kernel(margin=margin, eps=1e-6, n_valid=B, tb=tb)

    cost = pl.CostEstimate(
        flops=int(4 * B * D + 10 * B),
        transcendentals=int(B),                                   # sqrt per row
        bytes_accessed=int(B * D * (x1_isz + x2_isz)
                           + B * jnp.dtype(label.dtype).itemsize
                           + n_tiles * 8 * 128 * 4),
    )

    partials = pl.pallas_call(
        kernel,
        out_shape=jax.ShapeDtypeStruct((n_tiles, 8, 128), jnp.float32),
        grid=(n_tiles,),
        in_specs=[
            pl.BlockSpec((tb, D), lambda i: (i, 0)),   # output1 tile (no pad copy)
            pl.BlockSpec((tb, D), lambda i: (i, 0)),   # output2 tile
            pl.BlockSpec((tb, 1), lambda i: (i, 0)),   # label tile
        ],
        out_specs=pl.BlockSpec((1, 8, 128), lambda i: (i, 0, 0)),
        compiler_params=pltpu.CompilerParams(
            # Independent per-tile partial sums -> megacore-shardable on v7x.
            dimension_semantics=("parallel",),
            vmem_limit_bytes=vmem_limit),
        cost_estimate=cost,
    )(output1, output2, label)

    return jnp.sum(partials[:, 0, 0]) / jnp.float32(B)


if __name__ == "__main__":
    key = jax.random.PRNGKey(0)
    k1, k2, k3 = jax.random.split(key, 3)

    # Small shapes; B deliberately NOT a multiple of the tile to exercise the
    # in-kernel mask (no wrapper padding), and max_block_rows=8 to exercise
    # multi-tile partial sums.
    B, D = 20, 64
    margin = 2.0
    out1 = jax.random.normal(k1, (B, D), dtype=jnp.float32)
    out2 = jax.random.normal(k2, (B, D), dtype=jnp.float32)
    label = jax.random.bernoulli(k3, 0.5, (B, 1)).astype(jnp.float32)

    # Pure-JAX reference (matches F.pairwise_distance with eps=1e-6, keepdim=True).
    diff = out1 - out2 + 1e-6
    d = jnp.sqrt(jnp.sum(diff * diff, axis=-1, keepdims=True))
    ref = jnp.mean((1.0 - label) * d ** 2
                   + label * jnp.maximum(margin - d, 0.0) ** 2)

    # 1) Multi-tile + ragged last tile (tb=8 -> 3 tiles, last has 4 masked rows).
    loss = contrastive_loss(out1, out2, label, margin=margin, max_block_rows=8)
    loss = jax.block_until_ready(loss)
    assert loss.shape == ()
    assert jnp.allclose(loss, ref, atol=1e-5, rtol=1e-5), (loss, ref)

    # 2) Default VMEM-budgeted tile (single ragged tile here).
    loss_auto = contrastive_loss(out1, out2, label, margin=margin)
    loss_auto = jax.block_until_ready(loss_auto)
    assert jnp.allclose(loss_auto, ref, atol=1e-5, rtol=1e-5), (loss_auto, ref)

    # 3) bf16 inputs exercise the in-kernel upcast path (no wrapper f32 copies).
    o1b = out1.astype(jnp.bfloat16)
    o2b = out2.astype(jnp.bfloat16)
    diffb = o1b.astype(jnp.float32) - o2b.astype(jnp.float32) + 1e-6
    db = jnp.sqrt(jnp.sum(diffb * diffb, axis=-1, keepdims=True))
    refb = jnp.mean((1.0 - label) * db ** 2
                    + label * jnp.maximum(margin - db, 0.0) ** 2)
    loss_bf16 = contrastive_loss(o1b, o2b, label, margin=margin, max_block_rows=8)
    loss_bf16 = jax.block_until_ready(loss_bf16)
    assert jnp.allclose(loss_bf16, refb, atol=1e-3, rtol=1e-3), (loss_bf16, refb)

    print("KERNEL_OK")
</pallas_src>

<mosaic_0001>
module attributes {stable_mosaic.version = 11 : i64} {
  func.func @kernel(%arg0: i32, %arg1: memref<8x64xf32, #tpu.memory_space<vmem>>, %arg2: memref<8x64xf32, #tpu.memory_space<vmem>>, %arg3: memref<8x1xf32, #tpu.memory_space<vmem>>, %arg4: memref<1x8x128xf32, #tpu.memory_space<vmem>>) attributes {dimension_semantics = [#tpu.dimension_semantics<parallel>], iteration_bounds = array<i64: 3>, scalar_prefetch = 0 : i64, scratch_operands = 0 : i64, tpu.core_type = #tpu.core_type<tc>, window_params = [{transform_indices = @transform_0, window_bounds = array<i64: 8, 64>}, {transform_indices = @transform_1, window_bounds = array<i64: 8, 64>}, {transform_indices = @transform_2, window_bounds = array<i64: 8, 1>}, {transform_indices = @transform_3, window_bounds = array<i64: 1, 8, 128>}]} {
    %c0 = arith.constant 0 : index
    %c0_0 = arith.constant 0 : index
    %0 = vector.load %arg1[%c0, %c0_0] : memref<8x64xf32, #tpu.memory_space<vmem>>, vector<8x64xf32>
    %c0_1 = arith.constant 0 : index
    %c0_2 = arith.constant 0 : index
    %1 = vector.load %arg2[%c0_1, %c0_2] : memref<8x64xf32, #tpu.memory_space<vmem>>, vector<8x64xf32>
    %c0_3 = arith.constant 0 : index
    %c0_4 = arith.constant 0 : index
    %2 = vector.load %arg3[%c0_3, %c0_4] : memref<8x1xf32, #tpu.memory_space<vmem>>, vector<8x1xf32>
    %3 = arith.subf %0, %1 : vector<8x64xf32>
    %cst = arith.constant 9.99999997E-7 : f32
    %4 = vector.broadcast %cst : f32 to vector<8x64xf32>
    %5 = arith.addf %3, %4 : vector<8x64xf32>
    %6 = arith.mulf %5, %5 : vector<8x64xf32>
    %cst_5 = arith.constant dense<0.000000e+00> : vector<8xf32>
    %7 = vector.multi_reduction <add>, %6, %cst_5 [1] : vector<8x64xf32> to vector<8xf32>
    %8 = vector.shape_cast %7 : vector<8xf32> to vector<8x1xf32>
    %9 = math.sqrt %8 : vector<8x1xf32>
    %cst_6 = arith.constant 2.000000e+00 : f32
    %10 = vector.broadcast %cst_6 : f32 to vector<8x1xf32>
    %11 = arith.subf %10, %9 : vector<8x1xf32>
    %cst_7 = arith.constant 0.000000e+00 : f32
    %12 = vector.broadcast %cst_7 : f32 to vector<8x1xf32>
    %13 = arith.maximumf %11, %12 : vector<8x1xf32>
    %cst_8 = arith.constant 1.000000e+00 : f32
    %14 = vector.broadcast %cst_8 : f32 to vector<8x1xf32>
    %15 = arith.subf %14, %2 : vector<8x1xf32>
    %16 = arith.mulf %15, %8 : vector<8x1xf32>
    %17 = arith.mulf %13, %13 : vector<8x1xf32>
    %18 = arith.mulf %2, %17 : vector<8x1xf32>
    %19 = arith.addf %16, %18 : vector<8x1xf32>
    %c8_i32 = arith.constant 8 : i32
    %20 = arith.muli %arg0, %c8_i32 : i32
    %21 = tpu.iota {dimensions = array<i32: 0>} : vector<8x1xi32>
    %22 = vector.broadcast %20 : i32 to vector<8x1xi32>
    %23 = arith.addi %22, %21 : vector<8x1xi32>
    %c20_i32 = arith.constant 20 : i32
    %24 = vector.broadcast %c20_i32 : i32 to vector<8x1xi32>
    %25 = arith.cmpi slt, %23, %24 : vector<8x1xi32>
    %cst_9 = arith.constant 0.000000e+00 : f32
    %26 = vector.broadcast %cst_9 : f32 to vector<8x1xf32>
    %27 = arith.select %25, %19, %26 : vector<8x1xi1>, vector<8x1xf32>
    %28 = vector.shape_cast %27 : vector<8x1xf32> to vector<1x8x1xf32>
    %cst_10 = arith.constant dense<0.000000e+00> : vector<1xf32>
    %29 = vector.multi_reduction <add>, %28, %cst_10 [1, 2] : vector<1x8x1xf32> to vector<1xf32>
    %30 = vector.shape_cast %29 : vector<1xf32> to vector<1x1x1xf32>
    %31 = vector.extract %30[0, 0, 0] : f32 from vector<1x1x1xf32>
    %32 = vector.broadcast %31 : f32 to vector<1x8x128xf32>
    %c0_11 = arith.constant 0 : index
    %c0_12 = arith.constant 0 : index
    %c0_13 = arith.constant 0 : index
    %33 = vector.load %arg4[%c0_11, %c0_12, %c0_13] : memref<1x8x128xf32, #tpu.memory_space<vmem>>, vector<1x8x128xf32>
    tpu.vector_store %arg4[%c0_11, %c0_12, %c0_13], %32 {strides = array<i32>} : memref<1x8x128xf32, #tpu.memory_space<vmem>>, vector<1x8x128xf32>,
    return
  }
  func.func @transform_0(%arg0: i32) -> (i32, i32) {
    %c0_i32 = arith.constant 0 : i32
    %c0_i32_0 = arith.constant 0 : i32
    return %arg0, %c0_i32 : i32, i32
  }
  func.func @transform_1(%arg0: i32) -> (i32, i32) {
    %c0_i32 = arith.constant 0 : i32
    %c0_i32_0 = arith.constant 0 : i32
    return %arg0, %c0_i32 : i32, i32
  }
  func.func @transform_2(%arg0: i32) -> (i32, i32) {
    %c0_i32 = arith.constant 0 : i32
    %c0_i32_0 = arith.constant 0 : i32
    return %arg0, %c0_i32 : i32, i32
  }
  func.func @transform_3(%arg0: i32) -> (i32, i32, i32) {
    %c0_i32 = arith.constant 0 : i32
    %c0_i32_0 = arith.constant 0 : i32
    %c0_i32_1 = arith.constant 0 : i32
    return %arg0, %c0_i32, %c0_i32_0 : i32, i32, i32
  }
}

</mosaic_0001>

<bundles_post_ra>
// kernel: contrastive_loss.1
= control target key start
LH: loop header
LB: loop body
LE: loop exit
PB: predicated region body
PF: predicated region fallthrough
CT: control target
= control target key end

     0   :  { %8 = vsyncpa [#allocation3], 0  ;;  %s615_s0 = inlined_call_operand.vmem [shape: f32[20,64], index: 0, kind: input, shape index: {}]   ;;  %s616_s1 = inlined_call_operand.hbm [shape: f32[20,64], index: 1, kind: input, shape index: {}]   ;;  %s617_s2 = inlined_call_operand.vmem [shape: f32[20,1], index: 2, kind: input, shape index: {}]   ;;  %s618_s3 = inlined_call_operand.vmem [shape: f32[3,8,128], index: 3, kind: output, shape index: {}]  }
   0x1   :  { %10 = vsyncpa [#allocation3 + $0x1], 0  ;;  %s496_s12 = smov 0   ;;  %s498_s13 = smov 0  }
   0x2   :  { %s500_s14 = smov 0   ;;  %s502_s15 = smov 0  }
   0x3 LB: > { %s515_s16 = sadd.s32 4294967295, %s473_s15   ;;  %s518_s17 = sadd.s32 1, %s473_s15   ;;  %s473_s15 = sphi %s502_s15, %s626_s15   ;;  %s469_s14 = sphi %s500_s14, %s625_s14   ;;  %s465_s13 = sphi %s498_s13, %s624_s13   ;;  %s461_s12 = sphi %s496_s12, %s623_s12  }
   0x4   : > { %s46_s18 = ssub.s32 %s473_s15, %s518_s17  ;;  %s49_s19 = sadd.s32 1, %s469_s14 }
   0x5   : > { %p47_p0 = scmp.eq.s32.totalorder %s46_s18, 0  ;;  %p56_p1 = scmp.ne.s32.totalorder %s469_s14, %s465_s13 }
   0x6   : > { %p57_p2 = scmp.eq.s32.totalorder %s473_s15, 0  ;;  %p62_p3 = scmp.ne.s32.totalorder %s465_s13, %s461_s12 }
   0x7   : > { %s528_s20 = scalar_select %p47_p0, %s469_s14, %s49_s19  }
   0x8   : > { %p58_p4 = por %p57_p2, %p56_p1  ;;  %p63_p5 = scmp.eq.s32.totalorder %s515_s16, 0 }
   0x9   : > { %p374_p6 = scmp.lt.s32.totalorder %s473_s15, 3  ;;  %s145_s22 = sand.u32 1, %s469_s14  }
   0xa   : > { %p532_p7 = por %p63_p5, %p62_p3  ;;  %s356_s23 = sshll.u32 %s145_s22, 3 }
   0xb   : > { %s357_s24 = sshll.u32 %s473_s15, 7  ;;  %s149_s28 = scalar_lea.vmem [#allocation2], %s356_s23 }
   0xc   : > { %s541_s27 = scalar_lea.hbm %s616_s1, %s357_s24  ;;  %s156_s29 = sshll.u32 %s149_s28, 4  ;;  %s543_s29 = int_to_ptr.vmem [resolvable:$true] %s156_s29 }
   0xd   : > { %p545_p8 = pnand %p374_p6, %p58_p4  ;;  %s146_s4 = scalar_lea.sflag [#allocation3], %s145_s22 }
   0xe   : > { %s409_s5 = scalar_lea.hbm %s541_s27, 128  ;;  %s414_s8 = scalar_lea.hbm %s616_s1, 384 }
   0xf   : > { %p410_p11 = scmp.ne.s32.totalorder %s541_s27, %s409_s5  ;;  %p411_p12 = pneg %p545_p8 }
  0x10   : > { %p415_p1 = scmp.lt.u32.totalorder %s541_s27, %s616_s1  ;;  %p416_p2 = scmp.lt.u32.totalorder %s414_s8, %s409_s5 }
  0x11   : > { %p412_p13 = pnand %p411_p12, %p410_p11  ;;  %p418_p4 = scmp.lt.u32.totalorder %s409_s5, %s541_s27 }
  0x12   : > { %p417_p3 = por %p416_p2, %p415_p1 }
  0x13   : > { %p413_p0 = pneg %p412_p13 }
  0x14   : > { %p419_p5 = por %p418_p4, %p417_p3 }
  0x16   : > { %p420_p6 = pnand %p419_p5, %p413_p0 }
  0x18   : > { %423 = shalt.err (!%p420_p6)
}
  0x19   : > { %s424_s11 = scalar_lea.vmem %s543_s29, 128  ;;  %s475_s12 = smov [#allocation2]  }
  0x1a   : > { %p425_p11 = scmp.ne.s32.totalorder %s543_s29, %s424_s11  ;;  %s429_s18 = sshll.u32 %s475_s12, 4  ;;  %s430_s18 = int_to_ptr.vmem [resolvable:$false] %s429_s18 }
  0x1b   : > { %s431_s19 = scalar_lea.vmem %s430_s18, 256  ;;  %p432_p10 = scmp.lt.s32.totalorder %s543_s29, %s430_s18 }
  0x1c   : > { %p427_p13 = pnand %p425_p11, %p411_p12  ;;  %p433_p1 = scmp.lt.s32.totalorder %s431_s19, %s424_s11 }
  0x1e   : > { %p428_p9 = pneg %p427_p13  ;;  %p434_p2 = por %p433_p1, %p432_p10 }
  0x20   : > { %p435_p3 = pnand %p434_p2, %p428_p9 }
  0x22   : > { %438 = shalt.err (!%p435_p3)
}
  0x23   : > { %373 = dma.hbm_to_vmem [thread:$0]  (!%p545_p8), %s541_s27, 128, %s543_s29, %s146_s4  }
  0x24   : > { %p621_p0 = scmp.lt.s32.totalorder %s473_s15, 4  ;;  %p622_p4 = scmp.ge.s32.totalorder %s473_s15, 1 }
  0x26   : > { %p169_p12 = pnand %p622_p4, %p621_p0 }
  0x27   : > { %s174_s22 = sand.u32 (!%p169_p12), 1, %s465_s13  }
  0x28   : > { %172 = sbr.rel (%p169_p12) target bundleno = 437 (0x1b5), region = 32  ;;  %s359_s23 = sshll.u32 (!%p169_p12), %s174_s22, 3 }
  0x29   : > { %s175_s24 = scalar_lea.sflag (!%p169_p12), [#allocation3], %s174_s22  ;;  %s178_s25 = scalar_lea.vmem (!%p169_p12), [#allocation2], %s359_s23 }
  0x2f   : > { %456 = dma.done.wait (%p532_p7), %s175_s24, 128  }
  0x30   : > { %458 = vsyncadd (%p532_p7), %s175_s24, 4294967168  ;;  %p208_p9 = scmp.lt.s32.totalorder %s515_s16, 2  ;;  %v221_v1 = vld [vmem:[%s178_s25] sm:$0xff]  ;;  %vm226_vm0 = vcmask 523264   ;;  %v245_v8 = vlaneseq  ;;  %s363_s5 = sshll.u32 %s515_s16, 3  ;;  %vm251_vm4 = vcmask 7168  }
  0x31   : > { %v247_v16 = vstv %s363_s5 }
  0x32   : > { %s209_s26 = scalar_select %p208_p9, %s515_s16, 2  ;;  %v246_v14 = vshrl.u32 %v245_v8, 7 }
  0x34   : > { %s587_s27 = sshll.u32 %s209_s26, 3  ;;  %v248_v19 = vadd.s32 %v247_v16, %v246_v14 }
  0x35   : > { %s211_s29 = scalar_lea.vmem %s615_s0, %s587_s27  ;;  %s215_s4 = scalar_lea.vmem %s617_s2, %s587_s27 }
  0x36   : > { %v220_v0 = vld [vmem:[%s211_s29] sm:$0xff]  ;;  %vm249_vm3 = vcmp.lt.s32.totalorder %v248_v19, 20  ;;  %s219_s7 = scalar_lea.vmem %s618_s3, %s587_s27 }
  0x37   : > { %v223_v2 = vsub.f32 %v220_v0, %v221_v1  ;;  %v222_v12 = vld [vmem:[%s215_s4] sm:$0xff] }
  0x38   : > { %v239_v18 = vsub.f32 1.0, %v222_v12 }
  0x39   : > { %v224_v3 = vadd.f32 1e-06, %v223_v2 }
  0x3b   : > { %v225_v4 = vmul.f32 %v224_v3, %v224_v3 }
  0x3d   : > { %v227_v5 = vsel %vm226_vm0, %v225_v4, 0.0 }
  0x3e   : > { %228 = vadd.xlane.f32.xlu0 %v227_v5 }
  0xcb   : > { %v229_v6 = vpop.xlane.xlu0 %228 }
  0xcc   : > { %407 = vrsqrt.f32 %v229_v6  ;;  %vm232_vm1 = vcmp.eq.f32.partialorder %v229_v6, inf  ;;  %v235_v10 = vand.u32 2147483648, %v229_v6  ;;  %vm234_vm2 = vcmp.eq.f32.partialorder %v229_v6, 0.0 }
  0xcd   : > { %v240_v21 = vmul.f32 %v239_v18, %v229_v6 }
  0xd6   : > { %v408_v7 = vpop.eup %407 }
  0xd7   : > { %v231_v9 = vmul.f32 %v408_v7, %v229_v6 }
  0xd9   : > { %v233_v11 = vsel %vm232_vm1, %v229_v6, %v231_v9 }
  0xda   : > { %v236_v13 = vsel %vm234_vm2, %v235_v10, %v233_v11 }
  0xdb   : > { %v237_v15 = vsub.f32 2.0, %v236_v13 }
  0xdd   : > { %v238_v17 = vmax.f32 %v237_v15, 0.0 }
  0xdf   : > { %v241_v20 = vmul.f32 %v238_v17, %v238_v17 }
  0xe1   : > { %v242_v22 = vmul.f32 %v241_v20, %v222_v12 }
  0xe3   : > { %v243_v23 = vadd.f32 %v242_v22, %v240_v21 }
  0xe5   : > { %v250_v24 = vsel %vm249_vm3, %v243_v23, 0.0 }
  0xe6   : > { %v252_v25 = vsel %vm251_vm4, %v250_v24, 0.0 }
  0xe7   : > { %253 = vadd.xlane.f32.xlu0 %v252_v25 }
 0x174   : > { %v254_v26 = vpop.xlane.xlu0 %253 }
 0x175   : > { %v255_v27 = vrot.slane %v254_v26, 4 }
 0x177   : > { %v256_v28 = vadd.f32 %v255_v27, %v254_v26 }
 0x179   : > { %v257_v29 = vrot.slane %v256_v28, 2 }
 0x17b   : > { %v258_v30 = vadd.f32 %v257_v29, %v256_v28 }
 0x17d   : > { %v259_v31 = vrot.slane %v258_v30, 1 }
 0x17f   : > { %v260_v32 = vadd.f32 %v259_v31, %v258_v30 }
 0x181   : > { %366 = vpush %v260_v32 }
 0x1b2   : > { %s367_s8 = spop %366 }
 0x1b3   : > { %v262_v33 = vstv %s367_s8 }
 0x1b4   : > { %263 = vst [vmem:[%s219_s7] sm:$0xff] %v262_v33 }
 0x1b5 PF: > { %p13_p7 = scmp.ge.s32.totalorder %s518_s17, 5   ;;  %s623_s12 = smov %s465_s13 }
 0x1b6   : > { %s624_s13 = smov %s469_s14  ;;  %s625_s14 = smov %s528_s20 }
 0x1b7   : > { %s626_s15 = smov %s518_s17  ;;  %15 = sbr.rel (!%p13_p7) target bundleno = 3 (0x3), region = 78 }
 0x1be   :  { %283 = vsyncpa [#allocation3], 1 }
 0x1bf   :  { %285 = vsyncpa [#allocation3 + $0x1], 1 }

</bundles_post_ra>
